<compile_context>
chip_gen: v6e
topology: v6e:2x2x1
jax: 0.10.0
libtpu: 0.0.40
codegen_flags: <defaults>
</compile_context>

<pallas_src>
import math

import jax
import jax.numpy as jnp
from jax.experimental import pallas as pl
from jax.experimental.pallas import tpu as pltpu

_EPS = 1e-5
_BLOCK_BYTES = 2 * 1024 * 1024  # target VMEM per x block (f32 equivalent)


def _round_up(a, b):
    return (a + b - 1) // b * b


# --------------------------------------------------------------------------
# Pass 1: per-row (channel-row) sum and sum-of-squares, single sweep.
# --------------------------------------------------------------------------
def _stats_kernel(x_ref, sum_ref, sumsq_ref):
    # x_ref: (1, R, TS); sum_ref / sumsq_ref: (R, 1) accumulators resident
    # across the whole grid (constant output block index).
    @pl.when((pl.program_id(0) == 0) & (pl.program_id(1) == 0))
    def _init():
        sum_ref[...] = jnp.zeros_like(sum_ref)
        sumsq_ref[...] = jnp.zeros_like(sumsq_ref)

    x = x_ref[0].astype(jnp.float32)                 # no-op for f32 inputs
    sum_ref[...] += jnp.sum(x, axis=1, keepdims=True)
    sumsq_ref[...] += jnp.sum(x * x, axis=1, keepdims=True)


# --------------------------------------------------------------------------
# Pass 2: fused per-row affine  out = x * scale + bias.
# --------------------------------------------------------------------------
def _apply_kernel(x_ref, sb_ref, o_ref):
    # x_ref: (1, R, TS); sb_ref: (1, R, 2) packed [scale, bias]; o_ref: (1, R, TS)
    scale = sb_ref[0, :, 0:1]                        # (R, 1) f32
    bias = sb_ref[0, :, 1:2]                         # (R, 1) f32
    x = x_ref[0].astype(jnp.float32)                 # per-chunk upcast only
    o_ref[0] = (x * scale + bias).astype(o_ref.dtype)


# --------------------------------------------------------------------------
# Wrapper
# --------------------------------------------------------------------------
def conditional_batch_norm3d(x, y, embed_weight, num_features, bias=True,
                             eps=_EPS):
    """x: (N, C, D, H, W); y: (N,) int class ids;
    embed_weight: (num_classes, 2C) if bias else (num_classes, C)."""
    N, C, D, H, W = x.shape
    assert C == num_features
    S = D * H * W

    # Sublane fill factor: make the row count a multiple of 8 when C is not.
    k = 8 // math.gcd(C, 8)
    R = C * k

    # Lane-dense chunking of the folded spatial axis (multiple of 128).
    row_needed = _round_up(-(-S // k), 128)          # minimal padded row length
    ts_budget = max(128, (_BLOCK_BYTES // (R * 4)) // 128 * 128)
    ts = min(row_needed, ts_budget)
    sk = _round_up(row_needed, ts)                   # padded per-row length
    spad = sk * k
    num_s = sk // ts

    x2 = x.reshape(N, C, S)
    if spad != S:
        x2 = jnp.pad(x2, ((0, 0), (0, 0), (0, spad - S)))
    x2 = x2.reshape(N, R, sk)                        # contiguous view

    # ---- pass 1: streaming sum / sumsq ------------------------------------
    sum_r, sumsq_r = pl.pallas_call(
        _stats_kernel,
        out_shape=(
            jax.ShapeDtypeStruct((R, 1), jnp.float32),
            jax.ShapeDtypeStruct((R, 1), jnp.float32),
        ),
        grid_spec=pltpu.PrefetchScalarGridSpec(
            num_scalar_prefetch=0,
            grid=(N, num_s),
            in_specs=[pl.BlockSpec((1, R, ts), lambda n, s: (n, 0, s))],
            out_specs=[
                pl.BlockSpec((R, 1), lambda n, s: (0, 0)),
                pl.BlockSpec((R, 1), lambda n, s: (0, 0)),
            ],
        ),
        compiler_params=pltpu.CompilerParams(
            dimension_semantics=("arbitrary", "arbitrary")),
    )(x2)

    # ---- tiny (C,) / (N,C) math in plain JAX ------------------------------
    count = jnp.float32(N * S)                       # true (unpadded) count
    s1 = sum_r[:, 0].reshape(C, k).sum(axis=1)       # (C,)
    s2 = sumsq_r[:, 0].reshape(C, k).sum(axis=1)     # (C,)
    mean = s1 / count
    var = s2 / count - mean * mean                   # biased (BN training stats)
    inv = jax.lax.rsqrt(var + eps)

    e = jnp.take(embed_weight, y, axis=0).astype(jnp.float32)
    if bias:
        gamma = e[:, :C]
        beta = e[:, C:]
    else:
        gamma = e
        beta = jnp.zeros_like(gamma)

    scale_nc = gamma * inv[None, :]                  # (N, C)
    bias_nc = beta - mean[None, :] * scale_nc        # (N, C)
    sb = jnp.stack(
        [jnp.repeat(scale_nc, k, axis=1), jnp.repeat(bias_nc, k, axis=1)],
        axis=-1).astype(jnp.float32)                 # (N, R, 2) packed params

    # ---- pass 2: streaming FMA --------------------------------------------
    out = pl.pallas_call(
        _apply_kernel,
        out_shape=jax.ShapeDtypeStruct((N, R, sk), x.dtype),
        grid_spec=pltpu.PrefetchScalarGridSpec(
            num_scalar_prefetch=0,
            grid=(N, num_s),
            in_specs=[
                pl.BlockSpec((1, R, ts), lambda n, s: (n, 0, s)),
                pl.BlockSpec((1, R, 2), lambda n, s: (n, 0, 0)),
            ],
            out_specs=pl.BlockSpec((1, R, ts), lambda n, s: (n, 0, s)),
        ),
        compiler_params=pltpu.CompilerParams(
            dimension_semantics=("parallel", "parallel")),
    )(x2, sb)

    out = out.reshape(N, C, spad)[:, :, :S].reshape(N, C, D, H, W)
    return out


# --------------------------------------------------------------------------
# Pure-JAX reference mirroring the PyTorch forward (training-mode BN).
# --------------------------------------------------------------------------
def _reference(x, y, embed_weight, num_features, bias=True, eps=_EPS):
    C = num_features
    mean = jnp.mean(x, axis=(0, 2, 3, 4), keepdims=True)
    var = jnp.var(x, axis=(0, 2, 3, 4), keepdims=True)  # biased
    xhat = (x - mean) / jnp.sqrt(var + eps)
    e = embed_weight[y]
    if bias:
        gamma, beta = e[:, :C], e[:, C:]
        return (gamma[:, :, None, None, None] * xhat
                + beta[:, :, None, None, None])
    return e[:, :, None, None, None] * xhat


if __name__ == "__main__":
    key = jax.random.PRNGKey(0)
    kx, kg, kb, ky = jax.random.split(key, 4)

    N, C, D, H, W = 2, 4, 4, 8, 8
    num_classes = 10
    x = jax.random.normal(kx, (N, C, D, H, W), dtype=jnp.float32)
    y = jax.random.randint(ky, (N,), 0, num_classes)

    # Embedding table: module init is gamma ~ U[0,1), beta = 0; use a nonzero
    # beta here so the bias path is exercised (any trained weights are valid).
    embed_weight = jnp.concatenate(
        [jax.random.uniform(kg, (num_classes, C), dtype=jnp.float32),
         0.1 * jax.random.normal(kb, (num_classes, C), dtype=jnp.float32)],
        axis=1)

    out = conditional_batch_norm3d(x, y, embed_weight, C, bias=True)
    out = jax.block_until_ready(out)

    ref = _reference(x, y, embed_weight, C, bias=True)
    assert out.shape == (N, C, D, H, W)
    assert jnp.allclose(out, ref, atol=1e-4, rtol=1e-4), "mismatch vs reference"
    print("KERNEL_OK")
</pallas_src>

<mosaic_0001>
module attributes {stable_mosaic.version = 11 : i64} {
  func.func @_stats_kernel(%arg0: i32, %arg1: i32, %arg2: memref<1x8x128xf32, #tpu.memory_space<vmem>>, %arg3: memref<8x1xf32, #tpu.memory_space<vmem>>, %arg4: memref<8x1xf32, #tpu.memory_space<vmem>>) attributes {dimension_semantics = [#tpu.dimension_semantics<arbitrary>, #tpu.dimension_semantics<arbitrary>], iteration_bounds = array<i64: 2, 1>, scalar_prefetch = 0 : i64, scratch_operands = 0 : i64, tpu.core_type = #tpu.core_type<tc>, window_params = [{transform_indices = @transform_0, window_bounds = array<i64: 1, 8, 128>}, {pipeline_mode = #tpu.pipeline_mode<synchronous>, transform_indices = @transform_1, window_bounds = array<i64: 8, 1>}, {pipeline_mode = #tpu.pipeline_mode<synchronous>, transform_indices = @transform_2, window_bounds = array<i64: 8, 1>}]} {
    %c0_i32 = arith.constant 0 : i32
    %0 = arith.cmpi eq, %arg0, %c0_i32 : i32
    %c0_i32_0 = arith.constant 0 : i32
    %1 = arith.cmpi eq, %arg1, %c0_i32_0 : i32
    %2 = arith.andi %0, %1 : i1
    %3 = arith.extui %2 : i1 to i32
    %c0_i32_1 = arith.constant 0 : i32
    %4 = arith.cmpi ne, %3, %c0_i32_1 : i32
    scf.if %4 {
      %cst_13 = arith.constant 0.000000e+00 : f32
      %18 = vector.broadcast %cst_13 : f32 to vector<8x1xf32>
      %c0_14 = arith.constant 0 : index
      %c0_15 = arith.constant 0 : index
      %19 = vector.load %arg3[%c0_14, %c0_15] : memref<8x1xf32, #tpu.memory_space<vmem>>, vector<8x1xf32>
      tpu.vector_store %arg3[%c0_14, %c0_15], %18 {strides = array<i32>} : memref<8x1xf32, #tpu.memory_space<vmem>>, vector<8x1xf32>,
      %cst_16 = arith.constant 0.000000e+00 : f32
      %20 = vector.broadcast %cst_16 : f32 to vector<8x1xf32>
      %c0_17 = arith.constant 0 : index
      %c0_18 = arith.constant 0 : index
      %21 = vector.load %arg4[%c0_17, %c0_18] : memref<8x1xf32, #tpu.memory_space<vmem>>, vector<8x1xf32>
      tpu.vector_store %arg4[%c0_17, %c0_18], %20 {strides = array<i32>} : memref<8x1xf32, #tpu.memory_space<vmem>>, vector<8x1xf32>,
    } else {
    }
    %c0 = arith.constant 0 : index
    %c0_2 = arith.constant 0 : index
    %c0_3 = arith.constant 0 : index
    %5 = vector.load %arg2[%c0, %c0_2, %c0_3] : memref<1x8x128xf32, #tpu.memory_space<vmem>>, vector<1x8x128xf32>
    %6 = vector.shape_cast %5 : vector<1x8x128xf32> to vector<8x128xf32>
    %c0_4 = arith.constant 0 : index
    %c0_5 = arith.constant 0 : index
    %7 = vector.load %arg3[%c0_4, %c0_5] : memref<8x1xf32, #tpu.memory_space<vmem>>, vector<8x1xf32>
    %cst = arith.constant dense<0.000000e+00> : vector<8xf32>
    %8 = vector.multi_reduction <add>, %6, %cst [1] : vector<8x128xf32> to vector<8xf32>
    %9 = vector.shape_cast %8 : vector<8xf32> to vector<8x1xf32>
    %10 = arith.addf %7, %9 : vector<8x1xf32>
    %c0_6 = arith.constant 0 : index
    %c0_7 = arith.constant 0 : index
    %11 = vector.load %arg3[%c0_6, %c0_7] : memref<8x1xf32, #tpu.memory_space<vmem>>, vector<8x1xf32>
    tpu.vector_store %arg3[%c0_6, %c0_7], %10 {strides = array<i32>} : memref<8x1xf32, #tpu.memory_space<vmem>>, vector<8x1xf32>,
    %c0_8 = arith.constant 0 : index
    %c0_9 = arith.constant 0 : index
    %12 = vector.load %arg4[%c0_8, %c0_9] : memref<8x1xf32, #tpu.memory_space<vmem>>, vector<8x1xf32>
    %13 = arith.mulf %6, %6 : vector<8x128xf32>
    %cst_10 = arith.constant dense<0.000000e+00> : vector<8xf32>
    %14 = vector.multi_reduction <add>, %13, %cst_10 [1] : vector<8x128xf32> to vector<8xf32>
    %15 = vector.shape_cast %14 : vector<8xf32> to vector<8x1xf32>
    %16 = arith.addf %12, %15 : vector<8x1xf32>
    %c0_11 = arith.constant 0 : index
    %c0_12 = arith.constant 0 : index
    %17 = vector.load %arg4[%c0_11, %c0_12] : memref<8x1xf32, #tpu.memory_space<vmem>>, vector<8x1xf32>
    tpu.vector_store %arg4[%c0_11, %c0_12], %16 {strides = array<i32>} : memref<8x1xf32, #tpu.memory_space<vmem>>, vector<8x1xf32>,
    return
  }
  func.func @transform_0(%arg0: i32, %arg1: i32) -> (i32, i32, i32) {
    %c0_i32 = arith.constant 0 : i32
    %c0_i32_0 = arith.constant 0 : i32
    return %arg0, %c0_i32, %arg1 : i32, i32, i32
  }
  func.func @transform_1(%arg0: i32, %arg1: i32) -> (i32, i32) {
    %c0_i32 = arith.constant 0 : i32
    %c0_i32_0 = arith.constant 0 : i32
    %c0_i32_1 = arith.constant 0 : i32
    return %c0_i32, %c0_i32_0 : i32, i32
  }
  func.func @transform_2(%arg0: i32, %arg1: i32) -> (i32, i32) {
    %c0_i32 = arith.constant 0 : i32
    %c0_i32_0 = arith.constant 0 : i32
    %c0_i32_1 = arith.constant 0 : i32
    return %c0_i32, %c0_i32_0 : i32, i32
  }
}

</mosaic_0001>

<bundles_post_ra>
// kernel: tpu_custom_call.1
= control target key start
LH: loop header
LB: loop body
LE: loop exit
PB: predicated region body
PF: predicated region fallthrough
CT: control target
= control target key end

     0   :  { %8 = vsyncpa [#allocation3], 0  ;;  %s514_s0 = inlined_call_operand.hbm [shape: f32[2,8,128], index: 0, kind: input, shape index: {}]   ;;  %s515_s1 = inlined_call_operand.vmem [shape: f32[8,1], index: 1, kind: output, shape index: {0}]   ;;  %s516_s2 = inlined_call_operand.vmem [shape: f32[8,1], index: 2, kind: output, shape index: {1}]  }
   0x1   :  { %10 = vsyncpa [#allocation3 + $0x1], 0  ;;  %s400_s9 = smov 0   ;;  %s402_s10 = smov 0  }
   0x2   :  { %s404_s11 = smov 0   ;;  %s406_s12 = smov 0  }
   0x3   :  { %s408_s13 = smov 0   ;;  %s410_s14 = smov 0  }
   0x4 LB: > { %s236_s15 = sadd.s32 4294967295, %s381_s14   ;;  %s28_s16 = sadd.s32 1, %s377_s13  ;;  %s381_s14 = sphi %s410_s14, %s16_s14   ;;  %s377_s13 = sphi %s408_s13, %s524_s13   ;;  %s373_s12 = sphi %s406_s12, %s523_s12   ;;  %s369_s11 = sphi %s404_s11, %s522_s11   ;;  %s365_s10 = sphi %s402_s10, %s521_s10   ;;  %s361_s9 = sphi %s400_s9, %s520_s9  }
   0x5   : > { %p30_p0 = scmp.ge.s32.totalorder %s28_s16, 2  ;;  %s37_s17 = sadd.s32 1, %s369_s11 }
   0x6   : > { %p44_p1 = scmp.ne.s32.totalorder %s369_s11, %s365_s10  ;;  %p45_p2 = scmp.eq.s32.totalorder %s381_s14, 0 }
   0x7   : > { %s526_s16 = smov (%p30_p0, %s28_s16), 0  ;;  %p50_p4 = scmp.ne.s32.totalorder %s365_s10, %s361_s9 }
   0x8   : > { %p436_p3 = por %p45_p2, %p44_p1  ;;  %s32_s19 = ssub.s32 %s377_s13, %s526_s16 }
   0x9   : > { %p51_p5 = scmp.eq.s32.totalorder %s236_s15, 0  ;;  %p35_p6 = scmp.eq.s32.totalorder %s32_s19, 0 }
   0xa   : > { %p253_p8 = scmp.lt.s32.totalorder %s381_s14, 2  ;;  %s116_s22 = sand.u32 1, %s369_s11  }
   0xb   : > { %p443_p7 = por %p51_p5, %p50_p4  ;;  %s240_s23 = sshll.u32 %s377_s13, 7 }
   0xc   : > { %s449_s21 = scalar_select %p35_p6, %s369_s11, %s37_s17  }
   0xd   : > { %s239_s24 = sshll.u32 %s116_s22, 3  ;;  %s126_s27 = scalar_lea.hbm %s514_s0, %s240_s23 }
   0xe   : > { %s120_s28 = scalar_lea.vmem [#allocation2], %s239_s24  ;;  %p458_p9 = pnand %p253_p8, %p436_p3 }
   0xf   : > { %s128_s29 = sshll.u32 %s120_s28, 4  ;;  %p241_p10 = scmp.ge.s32.totalorder %s381_s14, 1  ;;  %s129_s29 = int_to_ptr.vmem [resolvable:$true] %s128_s29 }
  0x10   : > { %p133_p11 = scmp.lt.s32.totalorder %s381_s14, 3  ;;  %s117_s3 = scalar_lea.sflag [#allocation3], %s116_s22 }
  0x11   : > { %p305_p12 = pneg %p458_p9  ;;  %s316_s4 = scalar_lea.vmem %s129_s29, 128 }
  0x12   : > { %p317_p13 = scmp.ne.s32.totalorder %s129_s29, %s316_s4  ;;  %s383_s5 = smov [#allocation2]  }
  0x13   : > { %s321_s6 = sshll.u32 %s383_s5, 4  ;;  %s322_s6 = int_to_ptr.vmem [resolvable:$false] %s321_s6 }
  0x14   : > { %p319_p0 = pnand %p317_p13, %p305_p12  ;;  %s323_s7 = scalar_lea.vmem %s322_s6, 256 }
  0x15   : > { %p324_p2 = scmp.lt.s32.totalorder %s129_s29, %s322_s6  ;;  %p325_p3 = scmp.lt.s32.totalorder %s323_s7, %s316_s4 }
  0x16   : > { %p320_p1 = pneg %p319_p0 }
  0x17   : > { %p326_p4 = por %p325_p3, %p324_p2 }
  0x19   : > { %p327_p5 = pnand %p326_p4, %p320_p1 }
  0x1b   : > { %330 = shalt.err (!%p327_p5)
}
  0x1c   : > { %252 = dma.hbm_to_vmem [thread:$0]  (!%p458_p9), %s126_s27, 128, %s129_s29, %s117_s3  }
  0x1d   : > { %p134_p6 = pnand %p241_p10, %p133_p11 }
  0x1e   : > { %s139_s8 = sand.u32 (!%p134_p6), 1, %s365_s10  }
  0x1f   : > { %137 = sbr.rel (%p134_p6) target bundleno = 190 (0xbe), region = 24  ;;  %s242_s9 = sshll.u32 (!%p134_p6), %s139_s8, 3 }
  0x20   : > { %s140_s15 = scalar_lea.sflag (!%p134_p6), [#allocation3], %s139_s8  ;;  %s143_s17 = scalar_lea.vmem (!%p134_p6), [#allocation2], %s242_s9 }
  0x24   : > { %356 = dma.done.wait (%p443_p7), %s140_s15, 128  }
  0x25   : > { %358 = vsyncadd (%p443_p7), %s140_s15, 4294967168  ;;  %p159_p8 = scmp.eq.s32.totalorder %s373_s12, 0 }
  0x26   : > { %vm165_vm0 = vcmask (%p159_p8), 7168   ;;  %v384_v0 = vmov (%p159_p8), 0.0  }
  0x27   : > { %164 = sbr.rel (!%p159_p8) target bundleno = 44 (0x2c), region = 32  ;;  %166 = vst.msk [vmem:[%s515_s1] sm:$0xff] (%p159_p8), %vm165_vm0, %v384_v0  ;;  %167 = vst.msk [vmem:[%s516_s2] sm:$0xff] (%p159_p8), %vm165_vm0, %v384_v0 }
  0x2c PF: > { %v168_v1 = vld [vmem:[%s143_s17] sm:$0xff]  ;;  %vm173_vm1 = vcmask 7168  }
  0x2d   : > { %170 = vadd.xlane.f32.xlu0 %v168_v1  ;;  %v176_v2 = vmul.f32 %v168_v1, %v168_v1 }
  0x2e   : > { %v169_v3 = vld [vmem:[%s515_s1] sm:$0xff] }
  0x2f   : > { %v175_v6 = vld [vmem:[%s516_s2] sm:$0xff] }
  0x31   : > { %177 = vadd.xlane.f32.xlu0 %v176_v2 }
  0xb6   : > { %v171_v4 = vpop.xlane.xlu0 %170 }
  0xb7   : > { %v172_v5 = vadd.f32 %v171_v4, %v169_v3 }
  0xb9   : > { %174 = vst.msk [vmem:[%s515_s1] sm:$0xff] %vm173_vm1, %v172_v5 }
  0xba   : > { %v178_v7 = vpop.xlane.xlu0 %177 }
  0xbb   : > { %v179_v8 = vadd.f32 %v178_v7, %v175_v6 }
  0xbd   : > { %180 = vst.msk [vmem:[%s516_s2] sm:$0xff] %vm173_vm1, %v179_v8 }
  0xbe PF: > { %s16_s14 = sadd.s32 1, %s381_s14   ;;  %s520_s9 = smov %s365_s10 }
  0xbf   : > { %p13_p7 = scmp.ge.s32.totalorder %s16_s14, 4   ;;  %s521_s10 = smov %s369_s11 }
  0xc0   : > { %s522_s11 = smov %s449_s21  ;;  %s523_s12 = smov %s377_s13 }
  0xc1   : > { %s524_s13 = smov %s526_s16  ;;  %15 = sbr.rel (!%p13_p7) target bundleno = 4 (0x4), region = 72 }
  0xc6   :  { %198 = vsyncpa [#allocation3], 1 }
  0xc7   :  { %200 = vsyncpa [#allocation3 + $0x1], 1 }

</bundles_post_ra>
